<compile_context>
chip_gen: v7x
topology: tpu7x:2x2x1
jax: 0.10.0
libtpu: 0.0.40
codegen_flags: <defaults>
</compile_context>

<pallas_src>
import jax
import jax.numpy as jnp
from jax.experimental import pallas as pl
from jax.experimental.pallas import tpu as pltpu

IN_DIM = 50 * 7 * 7   # 2450
H_DIM = 100
OUT_DIM = 10
H_PAD = 128           # hidden dim padded to one full lane width
OUT_PAD = 128         # output dim padded to one full lane width
EPS = 1e-5
NEG_BIG = -1e30       # logit bias for padded softmax columns -> exp() == 0


def _label_classifier_kernel(x_ref,
                             w1_ref, b1_ref,
                             w2_ref, b2_ref,
                             w3_ref, b3_ref,
                             o_ref):
    # x arrives as f32 (no wrapper-side astype pass); cast on the VPU here —
    # the kernel is HBM-bound so the convert is free under the roofline.
    x = x_ref[...].astype(jnp.bfloat16)            # (bt, 2450)

    # block1: Linear(+folded BN) -> ReLU   (bf16 x bf16 -> f32 accumulate)
    h1 = jnp.dot(x, w1_ref[...], preferred_element_type=jnp.float32) + b1_ref[...]
    h1 = jnp.maximum(h1, 0.0)

    # block2: Linear(+folded BN) -> Dropout(eval: identity) -> ReLU
    h2 = jnp.dot(h1.astype(jnp.bfloat16), w2_ref[...],
                 preferred_element_type=jnp.float32) + b2_ref[...]
    h2 = jnp.maximum(h2, 0.0)

    # block3: Linear -> Softmax over the (padded) 128 columns; padded columns
    # have logit -1e30 so they contribute 0 to the max/sum.
    logits = jnp.dot(h2.astype(jnp.bfloat16), w3_ref[...],
                     preferred_element_type=jnp.float32) + b3_ref[...]
    m = jnp.max(logits, axis=1, keepdims=True)
    e = jnp.exp(logits - m)
    denom = jnp.sum(e, axis=1, keepdims=True)
    o_ref[...] = (e / denom).astype(o_ref.dtype)   # exact divide; EUP has slack


def _prepare_params(params):
    """Fold eval-mode BatchNorm into the Linear layers and pad to lane width."""
    (w1, b1, g1, be1, rm1, rv1,
     w2, b2, g2, be2, rm2, rv2,
     w3, b3) = params

    s1 = g1 / jnp.sqrt(rv1 + EPS)
    t1 = be1 - rm1 * s1
    s2 = g2 / jnp.sqrt(rv2 + EPS)
    t2 = be2 - rm2 * s2

    # y = (x @ W + b) * s + t  ==  x @ (W * s) + (b * s + t)
    w1f = w1 * s1[None, :]
    b1f = b1 * s1 + t1
    w2f = w2 * s2[None, :]
    b2f = b2 * s2 + t2

    w1p = jnp.zeros((IN_DIM, H_PAD), jnp.float32).at[:, :H_DIM].set(w1f)
    b1p = jnp.zeros((1, H_PAD), jnp.float32).at[:, :H_DIM].set(b1f)
    w2p = jnp.zeros((H_PAD, H_PAD), jnp.float32).at[:H_DIM, :H_DIM].set(w2f)
    b2p = jnp.zeros((1, H_PAD), jnp.float32).at[:, :H_DIM].set(b2f)
    w3p = jnp.zeros((H_PAD, OUT_PAD), jnp.float32).at[:H_DIM, :OUT_DIM].set(w3)
    b3p = jnp.full((1, OUT_PAD), NEG_BIG, jnp.float32).at[:, :OUT_DIM].set(b3)

    # Weights bf16 for the MXU (f32 accumulation); biases stay f32.
    return (w1p.astype(jnp.bfloat16), b1p,
            w2p.astype(jnp.bfloat16), b2p,
            w3p.astype(jnp.bfloat16), b3p)


def _round_up(x, m):
    return ((x + m - 1) // m) * m


def _default_tiling():
    """Per-generation (batch_tile, vmem_limit_bytes).

    v5e/v6e (128 MiB VMEM): fat 2048-row tiles, 80 MiB scoped limit.
    v7x (64 MiB VMEM):      1024-row tiles (2 x 9.6 MiB f32 x-buffers), 48 MiB.
    """
    try:
        vmem = pltpu.get_tpu_info().vmem_capacity_bytes
    except Exception:
        vmem = 64 * 1024 * 1024  # conservative: assume the smallest (v7x)
    if vmem >= 100 * 1024 * 1024:
        return 2048, 80 * 1024 * 1024
    return 1024, 48 * 1024 * 1024


def label_classifier_forward(x, params, *, batch_tile=None, vmem_limit_bytes=None):
    """x: (B, 2450) float32. Returns (B, 10) float32 softmax probabilities."""
    B = x.shape[0]
    w1p, b1p, w2p, b2p, w3p, b3p = _prepare_params(params)

    auto_bt, auto_vmem = _default_tiling()
    if batch_tile is None:
        batch_tile = auto_bt
    if vmem_limit_bytes is None:
        vmem_limit_bytes = auto_vmem
    batch_tile = _round_up(batch_tile, 16)

    # At least 2 grid steps when the batch allows it (v7x 2-TC sharding via the
    # "parallel" semantics); keep the tile a multiple of 16 for dense packed
    # sublane tiles. The batch tail is handled by Pallas edge blocks — no pad.
    bt = min(batch_tile, _round_up(pl.cdiv(B, 2), 16))
    grid = (pl.cdiv(B, bt),)

    def full(shape):
        # whole-array block, replicated across the batch grid
        return pl.BlockSpec(shape, lambda i: (0,) * len(shape))

    out = pl.pallas_call(
        _label_classifier_kernel,
        out_shape=jax.ShapeDtypeStruct((B, OUT_PAD), jnp.bfloat16),
        grid_spec=pltpu.PrefetchScalarGridSpec(
            num_scalar_prefetch=0,
            grid=grid,
            in_specs=[
                pl.BlockSpec((bt, IN_DIM), lambda i: (i, 0)),  # x (f32, cast in-kernel)
                full((IN_DIM, H_PAD)),    # w1 (bf16, BN folded)
                full((1, H_PAD)),         # b1 (f32, BN folded)
                full((H_PAD, H_PAD)),     # w2 (bf16, BN folded)
                full((1, H_PAD)),         # b2
                full((H_PAD, OUT_PAD)),   # w3 (bf16)
                full((1, OUT_PAD)),       # b3 (-1e30 on padded cols)
            ],
            out_specs=pl.BlockSpec((bt, OUT_PAD), lambda i: (i, 0)),
        ),
        compiler_params=pltpu.CompilerParams(
            dimension_semantics=("parallel",),
            vmem_limit_bytes=vmem_limit_bytes,
        ),
    )(x, w1p, b1p, w2p, b2p, w3p, b3p)

    # Tiny (B, 10) slice + cast back to f32 for the caller.
    return out[:, :OUT_DIM].astype(jnp.float32)


def init_params(key):
    ks = jax.random.split(key, 10)
    # Linear weights stored as (in, out) = transposed PyTorch layout.
    w1 = jax.random.normal(ks[0], (IN_DIM, H_DIM), jnp.float32) * 0.02
    b1 = jax.random.normal(ks[1], (H_DIM,), jnp.float32) * 0.02
    w2 = jax.random.normal(ks[2], (H_DIM, H_DIM), jnp.float32) * 0.1
    b2 = jax.random.normal(ks[3], (H_DIM,), jnp.float32) * 0.02
    w3 = jax.random.normal(ks[4], (H_DIM, OUT_DIM), jnp.float32) * 0.1
    b3 = jax.random.normal(ks[5], (OUT_DIM,), jnp.float32) * 0.02
    # BatchNorm1d parameters + running stats (deterministic, non-trivial).
    g1 = 1.0 + 0.1 * jax.random.normal(ks[6], (H_DIM,), jnp.float32)
    be1 = 0.1 * jax.random.normal(ks[7], (H_DIM,), jnp.float32)
    rm1 = 0.05 * jax.random.normal(ks[8], (H_DIM,), jnp.float32)
    rv1 = 1.0 + 0.1 * jnp.abs(jax.random.normal(ks[9], (H_DIM,), jnp.float32))
    g2 = jnp.ones((H_DIM,), jnp.float32)
    be2 = jnp.zeros((H_DIM,), jnp.float32)
    rm2 = jnp.zeros((H_DIM,), jnp.float32)
    rv2 = jnp.ones((H_DIM,), jnp.float32)
    return (w1, b1, g1, be1, rm1, rv1,
            w2, b2, g2, be2, rm2, rv2,
            w3, b3)


if __name__ == "__main__":
    key = jax.random.PRNGKey(0)
    k_x, k_p = jax.random.split(key)

    B = 16  # small smoke-test batch; real workloads should use B >> batch_tile
    x = jax.random.normal(k_x, (B, IN_DIM), jnp.float32)
    params = init_params(k_p)

    out = label_classifier_forward(x, params)
    out = jax.block_until_ready(out)

    assert out.shape == (B, OUT_DIM)
    # Softmax rows sum to 1 (tolerance for bf16 storage of the probabilities).
    assert bool(jnp.all(jnp.abs(jnp.sum(out, axis=1) - 1.0) < 1e-2))
    assert bool(jnp.all(jnp.isfinite(out)))
    assert bool(jnp.all(out >= 0.0))
    print("KERNEL_OK")
</pallas_src>

<mosaic_0001>
module attributes {stable_mosaic.version = 11 : i64} {
  func.func @_label_classifier_kernel(%arg0: i32, %arg1: memref<16x2450xf32, #tpu.memory_space<vmem>>, %arg2: memref<2450x128xbf16, #tpu.memory_space<vmem>>, %arg3: memref<1x128xf32, #tpu.memory_space<vmem>>, %arg4: memref<128x128xbf16, #tpu.memory_space<vmem>>, %arg5: memref<1x128xf32, #tpu.memory_space<vmem>>, %arg6: memref<128x128xbf16, #tpu.memory_space<vmem>>, %arg7: memref<1x128xf32, #tpu.memory_space<vmem>>, %arg8: memref<16x128xbf16, #tpu.memory_space<vmem>>) attributes {dimension_semantics = [#tpu.dimension_semantics<parallel>], iteration_bounds = array<i64: 1>, scalar_prefetch = 0 : i64, scratch_operands = 0 : i64, tpu.core_type = #tpu.core_type<tc>, window_params = [{transform_indices = @transform_0, window_bounds = array<i64: 16, 2450>}, {pipeline_mode = #tpu.pipeline_mode<synchronous>, transform_indices = @transform_1, window_bounds = array<i64: 2450, 128>}, {pipeline_mode = #tpu.pipeline_mode<synchronous>, transform_indices = @transform_2, window_bounds = array<i64: 1, 128>}, {pipeline_mode = #tpu.pipeline_mode<synchronous>, transform_indices = @transform_3, window_bounds = array<i64: 128, 128>}, {pipeline_mode = #tpu.pipeline_mode<synchronous>, transform_indices = @transform_4, window_bounds = array<i64: 1, 128>}, {pipeline_mode = #tpu.pipeline_mode<synchronous>, transform_indices = @transform_5, window_bounds = array<i64: 128, 128>}, {pipeline_mode = #tpu.pipeline_mode<synchronous>, transform_indices = @transform_6, window_bounds = array<i64: 1, 128>}, {transform_indices = @transform_7, window_bounds = array<i64: 16, 128>}]} {
    %c0 = arith.constant 0 : index
    %c0_0 = arith.constant 0 : index
    %0 = vector.load %arg1[%c0, %c0_0] : memref<16x2450xf32, #tpu.memory_space<vmem>>, vector<16x2450xf32>
    %1 = arith.truncf %0 : vector<16x2450xf32> to vector<16x2450xbf16>
    %c0_1 = arith.constant 0 : index
    %c0_2 = arith.constant 0 : index
    %2 = vector.load %arg2[%c0_1, %c0_2] : memref<2450x128xbf16, #tpu.memory_space<vmem>>, vector<2450x128xbf16>
    %cst = arith.constant dense<0.000000e+00> : vector<16x128xf32>
    %3 = tpu.matmul %1, %2, %cst {dimension_numbers = #tpu.dot_dimension_numbers<[1], [0], [0], [1], [0, 0, 1, 1], [], []>} : vector<16x2450xbf16>, vector<2450x128xbf16>, vector<16x128xf32> -> vector<16x128xf32>
    %c0_3 = arith.constant 0 : index
    %c0_4 = arith.constant 0 : index
    %4 = vector.load %arg3[%c0_3, %c0_4] : memref<1x128xf32, #tpu.memory_space<vmem>>, vector<1x128xf32>
    %5 = vector.broadcast %4 : vector<1x128xf32> to vector<16x128xf32>
    %6 = arith.addf %3, %5 : vector<16x128xf32>
    %cst_5 = arith.constant 0.000000e+00 : f32
    %7 = vector.broadcast %cst_5 : f32 to vector<16x128xf32>
    %8 = arith.maximumf %6, %7 : vector<16x128xf32>
    %9 = arith.truncf %8 : vector<16x128xf32> to vector<16x128xbf16>
    %c0_6 = arith.constant 0 : index
    %c0_7 = arith.constant 0 : index
    %10 = vector.load %arg4[%c0_6, %c0_7] : memref<128x128xbf16, #tpu.memory_space<vmem>>, vector<128x128xbf16>
    %cst_8 = arith.constant dense<0.000000e+00> : vector<16x128xf32>
    %11 = tpu.matmul %9, %10, %cst_8 {dimension_numbers = #tpu.dot_dimension_numbers<[1], [0], [0], [1], [0, 0, 1, 1], [], []>} : vector<16x128xbf16>, vector<128x128xbf16>, vector<16x128xf32> -> vector<16x128xf32>
    %c0_9 = arith.constant 0 : index
    %c0_10 = arith.constant 0 : index
    %12 = vector.load %arg5[%c0_9, %c0_10] : memref<1x128xf32, #tpu.memory_space<vmem>>, vector<1x128xf32>
    %13 = vector.broadcast %12 : vector<1x128xf32> to vector<16x128xf32>
    %14 = arith.addf %11, %13 : vector<16x128xf32>
    %cst_11 = arith.constant 0.000000e+00 : f32
    %15 = vector.broadcast %cst_11 : f32 to vector<16x128xf32>
    %16 = arith.maximumf %14, %15 : vector<16x128xf32>
    %17 = arith.truncf %16 : vector<16x128xf32> to vector<16x128xbf16>
    %c0_12 = arith.constant 0 : index
    %c0_13 = arith.constant 0 : index
    %18 = vector.load %arg6[%c0_12, %c0_13] : memref<128x128xbf16, #tpu.memory_space<vmem>>, vector<128x128xbf16>
    %cst_14 = arith.constant dense<0.000000e+00> : vector<16x128xf32>
    %19 = tpu.matmul %17, %18, %cst_14 {dimension_numbers = #tpu.dot_dimension_numbers<[1], [0], [0], [1], [0, 0, 1, 1], [], []>} : vector<16x128xbf16>, vector<128x128xbf16>, vector<16x128xf32> -> vector<16x128xf32>
    %c0_15 = arith.constant 0 : index
    %c0_16 = arith.constant 0 : index
    %20 = vector.load %arg7[%c0_15, %c0_16] : memref<1x128xf32, #tpu.memory_space<vmem>>, vector<1x128xf32>
    %21 = vector.broadcast %20 : vector<1x128xf32> to vector<16x128xf32>
    %22 = arith.addf %19, %21 : vector<16x128xf32>
    %cst_17 = arith.constant dense<0xFF800000> : vector<16xf32>
    %23 = vector.multi_reduction <maximumf>, %22, %cst_17 [1] : vector<16x128xf32> to vector<16xf32>
    %24 = vector.shape_cast %23 : vector<16xf32> to vector<16x1xf32>
    %25 = vector.broadcast %24 : vector<16x1xf32> to vector<16x128xf32>
    %26 = arith.subf %22, %25 : vector<16x128xf32>
    %27 = math.exp %26 : vector<16x128xf32>
    %cst_18 = arith.constant dense<0.000000e+00> : vector<16xf32>
    %28 = vector.multi_reduction <add>, %27, %cst_18 [1] : vector<16x128xf32> to vector<16xf32>
    %29 = vector.shape_cast %28 : vector<16xf32> to vector<16x1xf32>
    %30 = vector.broadcast %29 : vector<16x1xf32> to vector<16x128xf32>
    %31 = arith.divf %27, %30 : vector<16x128xf32>
    %32 = arith.truncf %31 : vector<16x128xf32> to vector<16x128xbf16>
    %c0_19 = arith.constant 0 : index
    %c0_20 = arith.constant 0 : index
    %33 = vector.load %arg8[%c0_19, %c0_20] : memref<16x128xbf16, #tpu.memory_space<vmem>>, vector<16x128xbf16>
    tpu.vector_store %arg8[%c0_19, %c0_20], %32 {strides = array<i32>} : memref<16x128xbf16, #tpu.memory_space<vmem>>, vector<16x128xbf16>,
    return
  }
  func.func @transform_0(%arg0: i32) -> (i32, i32) {
    %c0_i32 = arith.constant 0 : i32
    %c0_i32_0 = arith.constant 0 : i32
    return %arg0, %c0_i32 : i32, i32
  }
  func.func @transform_1(%arg0: i32) -> (i32, i32) {
    %c0_i32 = arith.constant 0 : i32
    %c0_i32_0 = arith.constant 0 : i32
    %c0_i32_1 = arith.constant 0 : i32
    return %c0_i32, %c0_i32_0 : i32, i32
  }
  func.func @transform_2(%arg0: i32) -> (i32, i32) {
    %c0_i32 = arith.constant 0 : i32
    %c0_i32_0 = arith.constant 0 : i32
    %c0_i32_1 = arith.constant 0 : i32
    return %c0_i32, %c0_i32_0 : i32, i32
  }
  func.func @transform_3(%arg0: i32) -> (i32, i32) {
    %c0_i32 = arith.constant 0 : i32
    %c0_i32_0 = arith.constant 0 : i32
    %c0_i32_1 = arith.constant 0 : i32
    return %c0_i32, %c0_i32_0 : i32, i32
  }
  func.func @transform_4(%arg0: i32) -> (i32, i32) {
    %c0_i32 = arith.constant 0 : i32
    %c0_i32_0 = arith.constant 0 : i32
    %c0_i32_1 = arith.constant 0 : i32
    return %c0_i32, %c0_i32_0 : i32, i32
  }
  func.func @transform_5(%arg0: i32) -> (i32, i32) {
    %c0_i32 = arith.constant 0 : i32
    %c0_i32_0 = arith.constant 0 : i32
    %c0_i32_1 = arith.constant 0 : i32
    return %c0_i32, %c0_i32_0 : i32, i32
  }
  func.func @transform_6(%arg0: i32) -> (i32, i32) {
    %c0_i32 = arith.constant 0 : i32
    %c0_i32_0 = arith.constant 0 : i32
    %c0_i32_1 = arith.constant 0 : i32
    return %c0_i32, %c0_i32_0 : i32, i32
  }
  func.func @transform_7(%arg0: i32) -> (i32, i32) {
    %c0_i32 = arith.constant 0 : i32
    %c0_i32_0 = arith.constant 0 : i32
    return %arg0, %c0_i32 : i32, i32
  }
}

</mosaic_0001>

<bundles_post_ra>
// kernel: tpu_custom_call.1
= control target key start
LH: loop header
LB: loop body
LE: loop exit
PB: predicated region body
PF: predicated region fallthrough
CT: control target
= control target key end

     0   :  { %12 = vsyncpa [#allocation3], 0  ;;  %s2988_s0 = inlined_call_operand.hbm [shape: f32[16,2450], index: 0, kind: input, shape index: {}]   ;;  %s2989_s1 = inlined_call_operand.hbm [shape: bf16[2450,128], index: 1, kind: input, shape index: {}]   ;;  %s2990_s2 = inlined_call_operand.vmem [shape: f32[1,128], index: 2, kind: input, shape index: {}]   ;;  %s2991_s3 = inlined_call_operand.hbm [shape: bf16[128,128], index: 3, kind: input, shape index: {}]   ;;  %s2992_s4 = inlined_call_operand.vmem [shape: f32[1,128], index: 4, kind: input, shape index: {}]   ;;  %s2993_s5 = inlined_call_operand.hbm [shape: bf16[128,128], index: 5, kind: input, shape index: {}]   ;;  %s2994_s6 = inlined_call_operand.vmem [shape: f32[1,128], index: 6, kind: input, shape index: {}]   ;;  %s2995_s7 = inlined_call_operand.hbm [shape: bf16[16,128], index: 7, kind: output, shape index: {}]  }
   0x1   :  { %13 = vsyncpa [#allocation6], 0 }
   0x2   :  { %14 = vsyncpa [#allocation9], 0 }
   0x3   :  { %15 = vsyncpa [#allocation4], 0  ;;  %s2820_s24 = smov [#allocation5]   ;;  %s2702_s28 = scalar_lea.hbm %s2989_s1, 19648 }
   0x4   :  { %s33_s25 = sshll.u32 %s2820_s24, 4  ;;  %p2703_p0 = scmp.ne.s32.totalorder %s2989_s1, %s2702_s28  ;;  %s34_s25 = int_to_ptr.vmem [resolvable:$true] %s33_s25 }
   0x5   :  { %p2706_p1 = scmp.lt.u32.totalorder %s2702_s28, %s2989_s1 }
   0x7   :  { %p2708_p2 = pnand %p2706_p1, %p2703_p0 }
   0x9   :  { %2711 = shalt.err (!%p2708_p2)
}
   0xa   :  { %s2712_s10 = scalar_lea.vmem %s34_s25, 19648  ;;  %p2717_p4 = scmp.lt.s32.totalorder %s34_s25, %s34_s25 }
   0xb   :  { %p2713_p3 = scmp.ne.s32.totalorder %s34_s25, %s2712_s10  ;;  %p2718_p5 = scmp.lt.s32.totalorder %s2712_s10, %s2712_s10 }
   0xd   :  { %p2719_p6 = por %p2718_p5, %p2717_p4 }
   0xf   :  { %p2720_p7 = pnand %p2719_p6, %p2713_p3 }
  0x11   :  { %2723 = shalt.err (!%p2720_p7)
}
  0x12   :  { %s2821_s11 = smov 64   ;;  %s2822_s12 = smov 4  }
  0x13   :  { %39 = dma.hbm_to_vmem [thread:$0]  %s2989_s1, 19648, %s34_s25, [#allocation6], %s2821_s11, %s2821_s11, %s2822_s12  }
  0x14   :  { %s2823_s15 = smov [#allocation2]   ;;  %s2724_s19 = scalar_lea.hbm %s2988_s0, 5120 }
  0x15   :  { %s21_s16 = sshll.u32 %s2823_s15, 4  ;;  %p2725_p8 = scmp.ne.s32.totalorder %s2988_s0, %s2724_s19  ;;  %s22_s16 = int_to_ptr.vmem [resolvable:$true] %s21_s16 }
  0x16   :  { %p2728_p9 = scmp.lt.u32.totalorder %s2724_s19, %s2988_s0 }
  0x18   :  { %p2730_p10 = pnand %p2728_p9, %p2725_p8 }
  0x1a   :  { %2733 = shalt.err (!%p2730_p10)
}
  0x1b   :  { %s2734_s24 = scalar_lea.vmem %s22_s16, 5120  ;;  %p2739_p12 = scmp.lt.s32.totalorder %s22_s16, %s22_s16 }
  0x1c   :  { %p2735_p11 = scmp.ne.s32.totalorder %s22_s16, %s2734_s24  ;;  %p2740_p13 = scmp.lt.s32.totalorder %s2734_s24, %s2734_s24 }
  0x1e   :  { %p2741_p0 = por %p2740_p13, %p2739_p12 }
  0x20   :  { %p2742_p1 = pnand %p2741_p0, %p2735_p11 }
  0x22   :  { %2745 = shalt.err (!%p2742_p1)
}
  0x23   :  { %s2824_s1 = smov 2560   ;;  %s2825_s25 = smov 160  }
  0x24   :  { %27 = dma.hbm_to_vmem [thread:$0]  %s2988_s0, 5120, %s22_s16, [#allocation3], %s2824_s1, %s2824_s1, %s2825_s25  }
  0x25   :  { %s2826_s28 = smov [#allocation7]   ;;  %s2827_s30 = smov [#allocation8]  }
  0x26   :  { %s47_s29 = sshll.u32 %s2826_s28, 4  ;;  %s61_s8 = sshll.u32 %s2827_s30, 4  ;;  %s48_s29 = int_to_ptr.vmem [resolvable:$true] %s47_s29  ;;  %s2899_s8 = int_to_ptr.vmem [resolvable:$true] %s61_s8 }
  0x27   :  { %s2746_s13 = scalar_lea.hbm %s2991_s3, 1024 }
  0x28   :  { %p2747_p2 = scmp.ne.s32.totalorder %s2991_s3, %s2746_s13  ;;  %p2750_p3 = scmp.lt.u32.totalorder %s2746_s13, %s2991_s3 }
  0x2a   :  { %p2752_p4 = pnand %p2750_p3, %p2747_p2 }
  0x2c   :  { %2755 = shalt.err (!%p2752_p4)
}
  0x2d   :  { %s2756_s0 = scalar_lea.vmem %s48_s29, 1024  ;;  %p2761_p6 = scmp.lt.s32.totalorder %s48_s29, %s48_s29 }
  0x2e   :  { %p2757_p5 = scmp.ne.s32.totalorder %s48_s29, %s2756_s0  ;;  %p2762_p7 = scmp.lt.s32.totalorder %s2756_s0, %s2756_s0 }
  0x30   :  { %p2763_p8 = por %p2762_p7, %p2761_p6 }
  0x32   :  { %p2764_p9 = pnand %p2763_p8, %p2757_p5 }
  0x34   :  { %2767 = shalt.err (!%p2764_p9)
}
  0x35   :  { %53 = dma.hbm_to_vmem [thread:$0]  %s2991_s3, 1024, %s48_s29, [#allocation6], %s2821_s11, %s2821_s11, %s2822_s12  }
  0x36   :  { %s2768_s22 = scalar_lea.hbm %s2993_s5, 1024 }
  0x37   :  { %p2769_p10 = scmp.ne.s32.totalorder %s2993_s5, %s2768_s22  ;;  %p2772_p11 = scmp.lt.u32.totalorder %s2768_s22, %s2993_s5 }
  0x39   :  { %p2774_p12 = pnand %p2772_p11, %p2769_p10 }
  0x3b   :  { %2777 = shalt.err (!%p2774_p12)
}
  0x3c   :  { %s2778_s26 = scalar_lea.vmem %s2899_s8, 1024  ;;  %p2783_p0 = scmp.lt.s32.totalorder %s2899_s8, %s2899_s8 }
  0x3d   :  { %p2779_p13 = scmp.ne.s32.totalorder %s2899_s8, %s2778_s26  ;;  %p2784_p1 = scmp.lt.s32.totalorder %s2778_s26, %s2778_s26 }
  0x3f   :  { %p2785_p2 = por %p2784_p1, %p2783_p0 }
  0x41   :  { %p2786_p3 = pnand %p2785_p2, %p2779_p13 }
  0x43   :  { %2789 = shalt.err (!%p2786_p3)
}
  0x44   :  { %67 = dma.hbm_to_vmem [thread:$0]  %s2993_s5, 1024, %s2899_s8, [#allocation9], %s2821_s11, %s2821_s11, %s2822_s12  }
  0x45   :  { %2812 = dma.done.wait [#allocation3], 5120  }
  0x46   :  { %2813 = vsyncadd [#allocation3], 4294962176 }
  0x47   :  { %2814 = dma.done.wait [#allocation6], 20672  }
  0x48   :  { %2815 = vsyncadd [#allocation6], 4294946624 }
  0x49   :  { %2816 = dma.done.wait [#allocation9], 1024  }
  0x4a   :  { %2817 = vsyncadd [#allocation9], 4294966272  ;;  %v2524_v0 = vld [vmem:[#allocation5 + $0x40] sm:$0xff]   ;;  %v2528_v4 = vld [vmem:[#allocation5 + $0x48] sm:$0xff]   ;;  %vm1382_vm0 = vcmask 1040384   ;;  %vm1378_vm1 = vcmask 146432  }
  0x4b   :  { %v2525_v1 = vld [vmem:[#allocation5 + $0xc0] sm:$0xff]   ;;  %2256 = vmatprep.subr.bf16.mxu0 %v2524_v0  ;;  %v2529_v5 = vld [vmem:[#allocation5 + $0xc8] sm:$0xff]   ;;  %v2532_v8 = vld [vmem:[#allocation5 + $0x50] sm:$0xff]   ;;  %vm2830_vm2 = vmmov 0  }
  0x4c   :  { %v2526_v2 = vld [vmem:[#allocation5] sm:$0xff]   ;;  %2278 = vmatprep.subr.bf16.mxu1 %v2525_v1  ;;  %v2530_v6 = vld [vmem:[#allocation5 + $0x8] sm:$0xff]   ;;  %v2533_v9 = vld [vmem:[#allocation5 + $0xd0] sm:$0xff]  }
  0x4d   :  { %v2527_v3 = vld [vmem:[#allocation5 + $0x80] sm:$0xff]   ;;  %2257 = vmatpush3.bf16.msra.mxu0 %v2526_v2  ;;  %v2531_v7 = vld [vmem:[#allocation5 + $0x88] sm:$0xff]   ;;  %v2534_v10 = vld [vmem:[#allocation5 + $0x10] sm:$0xff]  }
  0x4e   :  { %2279 = vmatpush3.bf16.msra.mxu1 %v2527_v3  ;;  %2258 = vmatprep.subr.bf16.mxu0 %v2528_v4  ;;  %v2535_v11 = vld [vmem:[#allocation5 + $0x90] sm:$0xff]   ;;  %v2536_v12 = vld [vmem:[#allocation5 + $0x58] sm:$0xff]   ;;  %v2540_v16 = vld [vmem:[#allocation5 + $0x60] sm:$0xff]  }
  0x4f   :  { %2280 = vmatprep.subr.bf16.mxu1 %v2529_v5  ;;  %v2537_v13 = vld [vmem:[#allocation5 + $0xd8] sm:$0xff]   ;;  %v2541_v17 = vld [vmem:[#allocation5 + $0xe0] sm:$0xff]   ;;  %v2544_v20 = vld [vmem:[#allocation5 + $0x68] sm:$0xff]  }
  0x50   :  { %v2538_v14 = vld [vmem:[#allocation5 + $0x18] sm:$0xff]   ;;  %v2542_v18 = vld [vmem:[#allocation5 + $0x20] sm:$0xff]   ;;  %v2545_v21 = vld [vmem:[#allocation5 + $0xe8] sm:$0xff]  }
  0x51   :  { %2259 = vmatpush3.bf16.msra.mxu0 %v2530_v6  ;;  %v2539_v15 = vld [vmem:[#allocation5 + $0x98] sm:$0xff]   ;;  %v2543_v19 = vld [vmem:[#allocation5 + $0xa0] sm:$0xff]   ;;  %v2546_v22 = vld [vmem:[#allocation5 + $0x28] sm:$0xff]  }
  0x52   :  { %2281 = vmatpush3.bf16.msra.mxu1 %v2531_v7  ;;  %2260 = vmatprep.subr.bf16.mxu0 %v2532_v8  ;;  %v2547_v23 = vld [vmem:[#allocation5 + $0xa8] sm:$0xff]   ;;  %v2548_v24 = vld [vmem:[#allocation5 + $0x70] sm:$0xff]   ;;  %v2552_v28 = vld [vmem:[#allocation5 + $0x78] sm:$0xff]  }
  0x53   :  { %2282 = vmatprep.subr.bf16.mxu1 %v2533_v9  ;;  %v2549_v25 = vld [vmem:[#allocation5 + $0xf0] sm:$0xff]   ;;  %v2553_v29 = vld [vmem:[#allocation5 + $0xf8] sm:$0xff]   ;;  %v84_v32 = vld [vmem:[#allocation2 + $0x8] sm:$0xff] }
  0x54   :  { %v2550_v26 = vld [vmem:[#allocation5 + $0x30] sm:$0xff]   ;;  %v2554_v30 = vld [vmem:[#allocation5 + $0x38] sm:$0xff]   ;;  %v104_v33 = vld [vmem:[#allocation2 + $0xa8] sm:$0xff] }
  0x55   :  { %2261 = vmatpush3.bf16.msra.mxu0 %v2534_v10  ;;  %v2551_v27 = vld [vmem:[#allocation5 + $0xb0] sm:$0xff]   ;;  %v2555_v31 = vld [vmem:[#allocation5 + $0xb8] sm:$0xff]   ;;  %v124_v35 = vpack.c.bf16 %v104_v33, %v84_v32  ;;  %v83_v37 = vld [vmem:[#allocation2] sm:$0xff] }
  0x56   :  { %2283 = vmatpush3.bf16.msra.mxu1 %v2535_v11  ;;  %2262 = vmatprep.subr.bf16.mxu0 %v2536_v12  ;;  %v86_v34 = vld [vmem:[#allocation2 + $0x18] sm:$0xff]  ;;  %v103_v38 = vld [vmem:[#allocation2 + $0xa0] sm:$0xff]  ;;  %v85_v41 = vld [vmem:[#allocation2 + $0x10] sm:$0xff] }
  0x57   :  { %2284 = vmatprep.subr.bf16.mxu1 %v2537_v13  ;;  %v106_v36 = vld [vmem:[#allocation2 + $0xb8] sm:$0xff]  ;;  %v123_v40 = vpack.c.bf16 %v103_v38, %v83_v37  ;;  %v105_v42 = vld [vmem:[#allocation2 + $0xb0] sm:$0xff]  ;;  %1418 = vmatprep.mubr.bf16.mxu0 %v124_v35  ;;  %v2556_v44 = vld [vmem:[#allocation5 + $0x140] sm:$0xff]  }
  0x58   :  { %v126_v39 = vpack.c.bf16 %v106_v36, %v86_v34  ;;  %v125_v43 = vpack.c.bf16 %v105_v42, %v85_v41  ;;  %v2557_v45 = vld [vmem:[#allocation5 + $0x1c0] sm:$0xff]   ;;  %v2560_v48 = vld [vmem:[#allocation5 + $0x148] sm:$0xff]   ;;  %v2564_v52 = vld [vmem:[#allocation5 + $0x150] sm:$0xff]  }
  0x59   :  { %2263 = vmatpush3.bf16.msra.mxu0 %v2538_v14  ;;  %v2558_v46 = vld [vmem:[#allocation5 + $0x100] sm:$0xff]   ;;  %v2561_v49 = vld [vmem:[#allocation5 + $0x1c8] sm:$0xff]   ;;  %v2565_v53 = vld [vmem:[#allocation5 + $0x1d0] sm:$0xff]  }
  0x5a   :  { %2285 = vmatpush3.bf16.msra.mxu1 %v2539_v15  ;;  %2264 = vmatprep.subr.bf16.mxu0 %v2540_v16  ;;  %v2559_v47 = vld [vmem:[#allocation5 + $0x180] sm:$0xff]   ;;  %v2562_v50 = vld [vmem:[#allocation5 + $0x108] sm:$0xff]   ;;  %v2566_v54 = vld [vmem:[#allocation5 + $0x110] sm:$0xff]  }
  0x5b   :  { %2286 = vmatprep.subr.bf16.mxu1 %v2541_v17  ;;  %1459 = vmatprep.mubr.bf16.mxu1 %v126_v39  ;;  %v2563_v51 = vld [vmem:[#allocation5 + $0x188] sm:$0xff]   ;;  %v2567_v55 = vld [vmem:[#allocation5 + $0x190] sm:$0xff]   ;;  %v2568_v56 = vld [vmem:[#allocation5 + $0x158] sm:$0xff]  }
  0x5c   :  { %v2569_v57 = vld [vmem:[#allocation5 + $0x1d8] sm:$0xff]   ;;  %v2572_v60 = vld [vmem:[#allocation5 + $0x160] sm:$0xff]   ;;  %v2576_v0 = vld [vmem:[#allocation5 + $0x168] sm:$0xff]  }
  0x5d   :  { %2265 = vmatpush3.bf16.msra.mxu0 %v2542_v18  ;;  %v2570_v58 = vld [vmem:[#allocation5 + $0x118] sm:$0xff]   ;;  %v2573_v61 = vld [vmem:[#allocation5 + $0x1e0] sm:$0xff]   ;;  %v2577_v1 = vld [vmem:[#allocation5 + $0x1e8] sm:$0xff]  }
  0x5e   :  { %2287 = vmatpush3.bf16.msra.mxu1 %v2543_v19  ;;  %2266 = vmatprep.subr.bf16.mxu0 %v2544_v20  ;;  %v2571_v59 = vld [vmem:[#allocation5 + $0x198] sm:$0xff]   ;;  %v2574_v62 = vld [vmem:[#allocation5 + $0x120] sm:$0xff]   ;;  %v2578_v2 = vld [vmem:[#allocation5 + $0x128] sm:$0xff]  }
  0x5f   :  { %2288 = vmatprep.subr.bf16.mxu1 %v2545_v21  ;;  %v2575_v63 = vld [vmem:[#allocation5 + $0x1a0] sm:$0xff]   ;;  %v2579_v3 = vld [vmem:[#allocation5 + $0x1a8] sm:$0xff]   ;;  %v2580_v4 = vld [vmem:[#allocation5 + $0x170] sm:$0xff]  }
  0x60   :  { %v2581_v5 = vld [vmem:[#allocation5 + $0x1f0] sm:$0xff]   ;;  %v2584_v8 = vld [vmem:[#allocation5 + $0x178] sm:$0xff]   ;;  %v88_v12 = vld [vmem:[#allocation2 + $0x28] sm:$0xff] }
  0x61   :  { %2267 = vmatpush3.bf16.msra.mxu0 %v2546_v22  ;;  %v2582_v6 = vld [vmem:[#allocation5 + $0x130] sm:$0xff]   ;;  %v2585_v9 = vld [vmem:[#allocation5 + $0x1f8] sm:$0xff]   ;;  %v108_v13 = vld [vmem:[#allocation2 + $0xc8] sm:$0xff] }
  0x62   :  { %2289 = vmatpush3.bf16.msra.mxu1 %v2547_v23  ;;  %2268 = vmatprep.subr.bf16.mxu0 %v2548_v24  ;;  %v2583_v7 = vld [vmem:[#allocation5 + $0x1b0] sm:$0xff]   ;;  %v2586_v10 = vld [vmem:[#allocation5 + $0x138] sm:$0xff]   ;;  %v128_v16 = vpack.c.bf16 %v108_v13, %v88_v12  ;;  %v87_v18 = vld [vmem:[#allocation2 + $0x20] sm:$0xff] }
  0x63   :  { %2290 = vmatprep.subr.bf16.mxu1 %v2549_v25  ;;  %v2587_v11 = vld [vmem:[#allocation5 + $0x1b8] sm:$0xff]   ;;  %v107_v19 = vld [vmem:[#allocation2 + $0xc0] sm:$0xff]  ;;  %v89_v20 = vld [vmem:[#allocation2 + $0x30] sm:$0xff] }
  0x64   :  { %v90_v14 = vld [vmem:[#allocation2 + $0x38] sm:$0xff]  ;;  %v127_v21 = vpack.c.bf16 %v107_v19, %v87_v18  ;;  %v109_v22 = vld [vmem:[#allocation2 + $0xd0] sm:$0xff]  ;;  %v2588_v24 = vld [vmem:[#allocation5 + $0x240] sm:$0xff]  }
  0x65   :  { %2269 = vmatpush3.bf16.msra.mxu0 %v2550_v26  ;;  %v110_v15 = vld [vmem:[#allocation2 + $0xd8] sm:$0xff]  ;;  %v129_v23 = vpack.c.bf16 %v109_v22, %v89_v20  ;;  %v2589_v25 = vld [vmem:[#allocation5 + $0x2c0] sm:$0xff]   ;;  %v2596_v32 = vld [vmem:[#allocation5 + $0x250] sm:$0xff]  }
  0x66   :  { %2291 = vmatpush3.bf16.msra.mxu1 %v2551_v27  ;;  %2270 = vmatprep.subr.bf16.mxu0 %v2552_v28  ;;  %v130_v17 = vpack.c.bf16 %v110_v15, %v90_v14  ;;  %v2590_v26 = vld [vmem:[#allocation5 + $0x200] sm:$0xff]   ;;  %v2592_v28 = vld [vmem:[#allocation5 + $0x248] sm:$0xff]   ;;  %v2597_v33 = vld [vmem:[#allocation5 + $0x2d0] sm:$0xff]  }
  0x67   :  { %2292 = vmatprep.subr.bf16.mxu1 %v2553_v29  ;;  %v2591_v27 = vld [vmem:[#allocation5 + $0x280] sm:$0xff]   ;;  %v2593_v29 = vld [vmem:[#allocation5 + $0x2c8] sm:$0xff]   ;;  %v2598_v34 = vld [vmem:[#allocation5 + $0x210] sm:$0xff]  }
  0x68   :  { %v2599_v35 = vld [vmem:[#allocation5 + $0x290] sm:$0xff]   ;;  %v2600_v36 = vld [vmem:[#allocation5 + $0x258] sm:$0xff]   ;;  %v2605_v41 = vld [vmem:[#allocation5 + $0x2e0] sm:$0xff]  }
  0x69   :  { %2271 = vmatpush3.bf16.msra.mxu0 %v2554_v30  ;;  %v2594_v30 = vld [vmem:[#allocation5 + $0x208] sm:$0xff]   ;;  %v2601_v37 = vld [vmem:[#allocation5 + $0x2d8] sm:$0xff]   ;;  %v2606_v42 = vld [vmem:[#allocation5 + $0x220] sm:$0xff]  }
  0x6a   :  { %2293 = vmatpush3.bf16.msra.mxu1 %v2555_v31  ;;  %2300 = vmatprep.subr.bf16.mxu0 %v2556_v44  ;;  %v2595_v31 = vld [vmem:[#allocation5 + $0x288] sm:$0xff]   ;;  %v2602_v38 = vld [vmem:[#allocation5 + $0x218] sm:$0xff]   ;;  %v2628_v12 = vld [vmem:[#allocation5 + $0x350] sm:$0xff]  }
  0x6b   :  { %2322 = vmatprep.subr.bf16.mxu1 %v2557_v45  ;;  %v2603_v39 = vld [vmem:[#allocation5 + $0x298] sm:$0xff]   ;;  %v2608_v44 = vld [vmem:[#allocation5 + $0x268] sm:$0xff]   ;;  %v2629_v13 = vld [vmem:[#allocation5 + $0x3d0] sm:$0xff]  }
  0x6c   :  { %1419 = vmatmul.mubr.bf16.vlgmr.msra.gmra.mrb[0].mxu0 %v123_v40  ;;  %v2604_v40 = vld [vmem:[#allocation5 + $0x260] sm:$0xff]   ;;  %v2609_v45 = vld [vmem:[#allocation5 + $0x2e8] sm:$0xff]   ;;  %v2630_v14 = vld [vmem:[#allocation5 + $0x310] sm:$0xff]  }
  0x6d   :  { %1460 = vmatmul.mubr.bf16.vlgmr.msra.gmra.mrb[0].mxu1 %v125_v43  ;;  %2301 = vmatpush3.bf16.msra.mxu0 %v2558_v46  ;;  %v2607_v43 = vld [vmem:[#allocation5 + $0x2a0] sm:$0xff]   ;;  %v2610_v46 = vld [vmem:[#allocation5 + $0x228] sm:$0xff]   ;;  %v2631_v15 = vld [vmem:[#allocation5 + $0x390] sm:$0xff]  }
  0x6e   :  { %2323 = vmatpush3.bf16.msra.mxu1 %v2559_v47  ;;  %2302 = vmatprep.subr.bf16.mxu0 %v2560_v48  ;;  %v2611_v47 = vld [vmem:[#allocation5 + $0x2a8] sm:$0xff]   ;;  %v2612_v48 = vld [vmem:[#allocation5 + $0x270] sm:$0xff]   ;;  %v2634_v18 = vld [vmem:[#allocation5 + $0x318] sm:$0xff]  }
  0x6f   :  { %2324 = vmatprep.subr.bf16.mxu1 %v2561_v49  ;;  %1500 = vmatprep.mubr.bf16.mxu0 %v128_v16  ;;  %v2613_v49 = vld [vmem:[#allocation5 + $0x2f0] sm:$0xff]   ;;  %v2632_v16 = vld [vmem:[#allocation5 + $0x358] sm:$0xff]   ;;  %v2636_v20 = vld [vmem:[#allocation5 + $0x360] sm:$0xff]  }
  0x70   :  { %1541 = vmatprep.mubr.bf16.mxu1 %v130_v17  ;;  %v2633_v17 = vld [vmem:[#allocation5 + $0x3d8] sm:$0xff]   ;;  %v2638_v22 = vld [vmem:[#allocation5 + $0x320] sm:$0xff]  }
  0x71   :  { %2303 = vmatpush3.bf16.msra.mxu0 %v2562_v50  ;;  %v2614_v50 = vld [vmem:[#allocation5 + $0x230] sm:$0xff]   ;;  %v2635_v19 = vld [vmem:[#allocation5 + $0x398] sm:$0xff]  }
  0x72   :  { %2325 = vmatpush3.bf16.msra.mxu1 %v2563_v51  ;;  %2304 = vmatprep.subr.bf16.mxu0 %v2564_v52  ;;  %v2615_v51 = vld [vmem:[#allocation5 + $0x2b0] sm:$0xff]   ;;  %v2616_v52 = vld [vmem:[#allocation5 + $0x278] sm:$0xff]  }
  0x73   :  { %2326 = vmatprep.subr.bf16.mxu1 %v2565_v53  ;;  %v2617_v53 = vld [vmem:[#allocation5 + $0x2f8] sm:$0xff]  }
  0x75   :  { %2305 = vmatpush3.bf16.msra.mxu0 %v2566_v54  ;;  %v2618_v54 = vld [vmem:[#allocation5 + $0x238] sm:$0xff]  }
  0x76   :  { %2327 = vmatpush3.bf16.msra.mxu1 %v2567_v55  ;;  %2306 = vmatprep.subr.bf16.mxu0 %v2568_v56  ;;  %v2619_v55 = vld [vmem:[#allocation5 + $0x2b8] sm:$0xff]   ;;  %v92_v56 = vld [vmem:[#allocation2 + $0x48] sm:$0xff] }
  0x77   :  { %2328 = vmatprep.subr.bf16.mxu1 %v2569_v57  ;;  %v112_v57 = vld [vmem:[#allocation2 + $0xe8] sm:$0xff] }
  0x79   :  { %2307 = vmatpush3.bf16.msra.mxu0 %v2570_v58  ;;  %v132_v58 = vpack.c.bf16 %v112_v57, %v92_v56  ;;  %v2659_v56 = vld [vmem:[#allocation5 + $0x410] sm:$0xff]  }
  0x7a   :  { %2329 = vmatpush3.bf16.msra.mxu1 %v2571_v59  ;;  %2308 = vmatprep.subr.bf16.mxu0 %v2572_v60  ;;  %v94_v59 = vld [vmem:[#allocation2 + $0x58] sm:$0xff]  ;;  %v2660_v57 = vld [vmem:[#allocation5 + $0x490] sm:$0xff]  }
  0x7b   :  { %2330 = vmatprep.subr.bf16.mxu1 %v2573_v61  ;;  %v114_v60 = vld [vmem:[#allocation2 + $0xf8] sm:$0xff]  ;;  %v91_v61 = vld [vmem:[#allocation2 + $0x40] sm:$0xff] }
  0x7d   :  { %2309 = vmatpush3.bf16.msra.mxu0 %v2574_v62  ;;  %v134_v62 = vpack.c.bf16 %v114_v60, %v94_v59  ;;  %v2662_v59 = vld [vmem:[#allocation5 + $0x418] sm:$0xff]  }
  0x7e   :  { %2331 = vmatpush3.bf16.msra.mxu1 %v2575_v63  ;;  %2310 = vmatprep.subr.bf16.mxu0 %v2576_v0  ;;  %v111_v63 = vld [vmem:[#allocation2 + $0xe0] sm:$0xff]  ;;  %v93_v0 = vld [vmem:[#allocation2 + $0x50] sm:$0xff]  ;;  %v2663_v60 = vld [vmem:[#allocation5 + $0x498] sm:$0xff]  }
  0x7f   :  { %2332 = vmatprep.subr.bf16.mxu1 %v2577_v1  ;;  %v113_v1 = vld [vmem:[#allocation2 + $0xf0] sm:$0xff] }
  0x81   :  { %2311 = vmatpush3.bf16.msra.mxu0 %v2578_v2  ;;  %v131_v2 = vpack.c.bf16 %v111_v63, %v91_v61  ;;  %v2664_v61 = vld [vmem:[#allocation5 + $0x460] sm:$0xff]  }
  0x82   :  { %2333 = vmatpush3.bf16.msra.mxu1 %v2579_v3  ;;  %2312 = vmatprep.subr.bf16.mxu0 %v2580_v4  ;;  %v133_v3 = vpack.c.bf16 %v113_v1, %v93_v0  ;;  %v2620_v4 = vld [vmem:[#allocation5 + $0x340] sm:$0xff]   ;;  %v2667_v0 = vld [vmem:[#allocation5 + $0x468] sm:$0xff]  }
  0x83   :  { %2334 = vmatprep.subr.bf16.mxu1 %v2581_v5  ;;  %v2621_v5 = vld [vmem:[#allocation5 + $0x3c0] sm:$0xff]   ;;  %v2668_v1 = vld [vmem:[#allocation5 + $0x428] sm:$0xff]  }
  0x84   :  { %v2666_v63 = vld [vmem:[#allocation5 + $0x4a0] sm:$0xff]  }
  0x85   :  { %2313 = vmatpush3.bf16.msra.mxu0 %v2582_v6  ;;  %v2622_v6 = vld [vmem:[#allocation5 + $0x300] sm:$0xff]  }
  0x86   :  { %2335 = vmatpush3.bf16.msra.mxu1 %v2583_v7  ;;  %2314 = vmatprep.subr.bf16.mxu0 %v2584_v8  ;;  %v2623_v7 = vld [vmem:[#allocation5 + $0x380] sm:$0xff]   ;;  %v2624_v8 = vld [vmem:[#allocation5 + $0x348] sm:$0xff]  }
  0x87   :  { %2336 = vmatprep.subr.bf16.mxu1 %v2585_v9  ;;  %v2625_v9 = vld [vmem:[#allocation5 + $0x3c8] sm:$0xff]  }
  0x89   :  { %2315 = vmatpush3.bf16.msra.mxu0 %v2586_v10  ;;  %v2626_v10 = vld [vmem:[#allocation5 + $0x308] sm:$0xff]  }
  0x8a   :  { %2337 = vmatpush3.bf16.msra.mxu1 %v2587_v11  ;;  %2344 = vmatprep.subr.bf16.mxu0 %v2588_v24  ;;  %v2627_v11 = vld [vmem:[#allocation5 + $0x388] sm:$0xff]  }
  0x8b   :  { %2366 = vmatprep.subr.bf16.mxu1 %v2589_v25  ;;  %v2640_v24 = vld [vmem:[#allocation5 + $0x368] sm:$0xff]  }
  0x8c   :  { %1501 = vmatmul.mubr.bf16.vlgmr.msra.gmra.mrb[4].mxu0 %v127_v21  ;;  %v2637_v21 = vld [vmem:[#allocation5 + $0x3e0] sm:$0xff]   ;;  %v2641_v25 = vld [vmem:[#allocation5 + $0x3e8] sm:$0xff]  }
  0x8d   :  { %1542 = vmatmul.mubr.bf16.vlgmr.msra.gmra.mrb[4].mxu1 %v129_v23  ;;  %2345 = vmatpush3.bf16.msra.mxu0 %v2590_v26  ;;  %v2639_v23 = vld [vmem:[#allocation5 + $0x3a0] sm:$0xff]   ;;  %v2642_v26 = vld [vmem:[#allocation5 + $0x328] sm:$0xff]  }
  0x8e   :  { %2367 = vmatpush3.bf16.msra.mxu1 %v2591_v27  ;;  %2346 = vmatprep.subr.bf16.mxu0 %v2592_v28  ;;  %v2643_v27 = vld [vmem:[#allocation5 + $0x3a8] sm:$0xff]   ;;  %v2644_v28 = vld [vmem:[#allocation5 + $0x370] sm:$0xff]  }
  0x8f   :  { %2368 = vmatprep.subr.bf16.mxu1 %v2593_v29  ;;  %1582 = vmatprep.mubr.bf16.mxu0 %v132_v58  ;;  %v2645_v29 = vld [vmem:[#allocation5 + $0x3f0] sm:$0xff]   ;;  %v2661_v58 = vld [vmem:[#allocation5 + $0x458] sm:$0xff]  }
  0x90   :  { %1623 = vmatprep.mubr.bf16.mxu1 %v134_v62  ;;  %v2665_v62 = vld [vmem:[#allocation5 + $0x420] sm:$0xff]  }
  0x91   :  { %2347 = vmatpush3.bf16.msra.mxu0 %v2594_v30  ;;  %v2646_v30 = vld [vmem:[#allocation5 + $0x330] sm:$0xff]  }
  0x92   :  { %2369 = vmatpush3.bf16.msra.mxu1 %v2595_v31  ;;  %2348 = vmatprep.subr.bf16.mxu0 %v2596_v32  ;;  %v2647_v31 = vld [vmem:[#allocation5 + $0x3b0] sm:$0xff]   ;;  %v2648_v32 = vld [vmem:[#allocation5 + $0x378] sm:$0xff]  }
  0x93   :  { %2370 = vmatprep.subr.bf16.mxu1 %v2597_v33  ;;  %v2649_v33 = vld [vmem:[#allocation5 + $0x3f8] sm:$0xff]  }
  0x95   :  { %2349 = vmatpush3.bf16.msra.mxu0 %v2598_v34  ;;  %v2650_v34 = vld [vmem:[#allocation5 + $0x338] sm:$0xff]  }
  0x96   :  { %2371 = vmatpush3.bf16.msra.mxu1 %v2599_v35  ;;  %2350 = vmatprep.subr.bf16.mxu0 %v2600_v36  ;;  %v2651_v35 = vld [vmem:[#allocation5 + $0x3b8] sm:$0xff]   ;;  %v96_v36 = vld [vmem:[#allocation2 + $0x68] sm:$0xff] }
  0x97   :  { %2372 = vmatprep.subr.bf16.mxu1 %v2601_v37  ;;  %v116_v37 = vld [vmem:[#allocation2 + $0x108] sm:$0xff] }
  0x99   :  { %2351 = vmatpush3.bf16.msra.mxu0 %v2602_v38  ;;  %v98_v38 = vld [vmem:[#allocation2 + $0x78] sm:$0xff] }
  0x9a   :  { %2373 = vmatpush3.bf16.msra.mxu1 %v2603_v39  ;;  %2352 = vmatprep.subr.bf16.mxu0 %v2604_v40  ;;  %v136_v39 = vpack.c.bf16 %v116_v37, %v96_v36  ;;  %v118_v40 = vld [vmem:[#allocation2 + $0x118] sm:$0xff] }
  0x9b   :  { %2374 = vmatprep.subr.bf16.mxu1 %v2605_v41  ;;  %v95_v41 = vld [vmem:[#allocation2 + $0x60] sm:$0xff] }
  0x9d   :  { %2353 = vmatpush3.bf16.msra.mxu0 %v2606_v42  ;;  %v115_v42 = vld [vmem:[#allocation2 + $0x100] sm:$0xff] }
  0x9e   :  { %2375 = vmatpush3.bf16.msra.mxu1 %v2607_v43  ;;  %2354 = vmatprep.subr.bf16.mxu0 %v2608_v44  ;;  %v138_v43 = vpack.c.bf16 %v118_v40, %v98_v38  ;;  %v135_v44 = vpack.c.bf16 %v115_v42, %v95_v41 }
  0x9f   :  { %2376 = vmatprep.subr.bf16.mxu1 %v2609_v45  ;;  %v97_v45 = vld [vmem:[#allocation2 + $0x70] sm:$0xff] }
  0xa1   :  { %2355 = vmatpush3.bf16.msra.mxu0 %v2610_v46  ;;  %v117_v46 = vld [vmem:[#allocation2 + $0x110] sm:$0xff] }
  0xa2   :  { %2377 = vmatpush3.bf16.msra.mxu1 %v2611_v47  ;;  %2356 = vmatprep.subr.bf16.mxu0 %v2612_v48  ;;  %v2828_v47 = vmov 0   ;;  %v137_v48 = vpack.c.bf16 %v117_v46, %v97_v45  ;;  %v2682_v46 = vld [vmem:[#allocation7 + $0x20] sm:$0xff]  }
  0xa3   :  { %2378 = vmatprep.subr.bf16.mxu1 %v2613_v49  ;;  %v2652_v49 = vld [vmem:[#allocation5 + $0x440] sm:$0xff]  }
  0xa5   :  { %2357 = vmatpush3.bf16.msra.mxu0 %v2614_v50  ;;  %v2653_v50 = vld [vmem:[#allocation5 + $0x400] sm:$0xff]  }
  0xa6   :  { %2379 = vmatpush3.bf16.msra.mxu1 %v2615_v51  ;;  %2358 = vmatprep.subr.bf16.mxu0 %v2616_v52  ;;  %v2654_v51 = vld [vmem:[#allocation5 + $0x480] sm:$0xff]   ;;  %v2655_v52 = vld [vmem:[#allocation5 + $0x448] sm:$0xff]  }
  0xa7   :  { %2380 = vmatprep.subr.bf16.mxu1 %v2617_v53  ;;  %v2656_v53 = vld [vmem:[#allocation5 + $0x408] sm:$0xff]  }
  0xa9   :  { %2359 = vmatpush3.bf16.msra.mxu0 %v2618_v54  ;;  %v2657_v54 = vld [vmem:[#allocation5 + $0x488] sm:$0xff]  }
  0xaa   :  { %2381 = vmatpush3.bf16.msra.mxu1 %v2619_v55  ;;  %2388 = vmatprep.subr.bf16.mxu0 %v2620_v4  ;;  %v2658_v55 = vld [vmem:[#allocation5 + $0x450] sm:$0xff]  }
  0xab   :  { %2410 = vmatprep.subr.bf16.mxu1 %v2621_v5  ;;  %v2671_v4 = vld [vmem:[#allocation5 + $0x430] sm:$0xff]   ;;  %v100_v5 = vld [vmem:[#allocation2 + $0x88] sm:$0xff] }
  0xac   :  { %1583 = vmatmul.mubr.bf16.vlgmr.msra.gmra.mrb[8].mxu0 %v131_v2  ;;  %v2669_v2 = vld [vmem:[#allocation5 + $0x4a8] sm:$0xff]  }
  0xad   :  { %1624 = vmatmul.mubr.bf16.vlgmr.msra.gmra.mrb[8].mxu1 %v133_v3  ;;  %2389 = vmatpush3.bf16.msra.mxu0 %v2622_v6  ;;  %v2670_v3 = vld [vmem:[#allocation5 + $0x470] sm:$0xff]  }
  0xae   :  { %2411 = vmatpush3.bf16.msra.mxu1 %v2623_v7  ;;  %2390 = vmatprep.subr.bf16.mxu0 %v2624_v8  ;;  %v2672_v6 = vld [vmem:[#allocation5 + $0x4b0] sm:$0xff]   ;;  %v2673_v7 = vld [vmem:[#allocation5 + $0x478] sm:$0xff]   ;;  %v120_v8 = vld [vmem:[#allocation2 + $0x128] sm:$0xff] }
  0xaf   :  { %2412 = vmatprep.subr.bf16.mxu1 %v2625_v9  ;;  %1664 = vmatprep.mubr.bf16.mxu0 %v136_v39  ;;  %v2674_v9 = vld [vmem:[#allocation5 + $0x438] sm:$0xff]  }
  0xb0   :  { %1705 = vmatprep.mubr.bf16.mxu1 %v138_v43 }
  0xb1   :  { %2391 = vmatpush3.bf16.msra.mxu0 %v2626_v10  ;;  %v140_v10 = vpack.c.bf16 %v120_v8, %v100_v5  ;;  %v2690_v5 = vld [vmem:[#allocation8 + $0x20] sm:$0xff]  }
  0xb2   :  { %2413 = vmatpush3.bf16.msra.mxu1 %v2627_v11  ;;  %2392 = vmatprep.subr.bf16.mxu0 %v2628_v12  ;;  %v2677_v11 = vld [vmem:[#allocation5 + $0x4c8] ss:$0 sps:$4 sm:$0x11]   ;;  %v102_v12 = vld [vmem:[#allocation2 + $0x98] sm:$0xff] }
  0xb3   :  { %2414 = vmatprep.subr.bf16.mxu1 %v2629_v13  ;;  %v99_v13 = vld [vmem:[#allocation2 + $0x80] sm:$0xff] }
  0xb5   :  { %2393 = vmatpush3.bf16.msra.mxu0 %v2630_v14  ;;  %v119_v14 = vld [vmem:[#allocation2 + $0x120] sm:$0xff] }
  0xb6   :  { %2415 = vmatpush3.bf16.msra.mxu1 %v2631_v15  ;;  %2394 = vmatprep.subr.bf16.mxu0 %v2632_v16  ;;  %v122_v15 = vld [vmem:[#allocation2 + $0x138] sm:$0xff] }
  0xb7   :  { %2416 = vmatprep.subr.bf16.mxu1 %v2633_v17  ;;  %v2675_v16 = vld [vmem:[#allocation5 + $0x4b8] sm:$0xff]   ;;  %v1384_v17 = vsel %vm1382_vm0, %v2677_v11, 0 }
  0xb9   :  { %2395 = vmatpush3.bf16.msra.mxu0 %v2634_v18  ;;  %v142_v18 = vpack.c.bf16 %v122_v15, %v102_v12 }
  0xba   :  { %2417 = vmatpush3.bf16.msra.mxu1 %v2635_v19  ;;  %2396 = vmatprep.subr.bf16.mxu0 %v2636_v20  ;;  %v139_v19 = vpack.c.bf16 %v119_v14, %v99_v13  ;;  %v2676_v20 = vld [vmem:[#allocation5 + $0x4c0] sm:$0xff]  }
  0xbb   :  { %2418 = vmatprep.subr.bf16.mxu1 %v2637_v21  ;;  %v101_v21 = vld [vmem:[#allocation2 + $0x90] sm:$0xff] }
  0xbd   :  { %2397 = vmatpush3.bf16.msra.mxu0 %v2638_v22  ;;  %v121_v22 = vld [vmem:[#allocation2 + $0x130] sm:$0xff] }
  0xbe   :  { %2419 = vmatpush3.bf16.msra.mxu1 %v2639_v23  ;;  %2398 = vmatprep.subr.bf16.mxu0 %v2640_v24  ;;  %v141_v23 = vpack.c.bf16 %v121_v22, %v101_v21  ;;  %v2678_v24 = vld [vmem:[#allocation7] sm:$0xff]  }
  0xbf   :  { %2420 = vmatprep.subr.bf16.mxu1 %v2641_v25  ;;  %v2829_v25 = vmov 0.0  }
  0xc1   :  { %2399 = vmatpush3.bf16.msra.mxu0 %v2642_v26  ;;  %v2679_v26 = vld [vmem:[#allocation7 + $0x8] sm:$0xff]  }
  0xc2   :  { %2421 = vmatpush3.bf16.msra.mxu1 %v2643_v27  ;;  %2400 = vmatprep.subr.bf16.mxu0 %v2644_v28  ;;  %v2680_v27 = vld [vmem:[#allocation7 + $0x10] sm:$0xff]   ;;  %v2681_v28 = vld [vmem:[#allocation7 + $0x18] sm:$0xff]  }
  0xc3   :  { %2422 = vmatprep.subr.bf16.mxu1 %v2645_v29 }
  0xc5   :  { %2401 = vmatpush3.bf16.msra.mxu0 %v2646_v30 }
  0xc6   :  { %2423 = vmatpush3.bf16.msra.mxu1 %v2647_v31  ;;  %2402 = vmatprep.subr.bf16.mxu0 %v2648_v32  ;;  %v2073_v31 = vld [vmem:[%s2990_s2] ss:$0 sm:$0xff] }
  0xc7   :  { %2424 = vmatprep.subr.bf16.mxu1 %v2649_v33 }
  0xc9   :  { %2403 = vmatpush3.bf16.msra.mxu0 %v2650_v34 }
  0xca   :  { %2425 = vmatpush3.bf16.msra.mxu1 %v2651_v35  ;;  %2432 = vmatprep.subr.bf16.mxu0 %v2652_v49  ;;  %v2685_v49 = vld [vmem:[#allocation7 + $0x38] sm:$0xff]  }
  0xcb   :  { %1755 = vmatprep.subr.bf16.mxu1 %v2828_v47 }
  0xcc   :  { %1665 = vmatmul.mubr.bf16.vlgmr.msra.gmra.mrb[12].mxu0 %v135_v44 }
  0xcd   :  { %1706 = vmatmul.mubr.bf16.vlgmr.msra.gmra.mrb[12].mxu1 %v137_v48  ;;  %2433 = vmatpush3.bf16.msra.mxu0 %v2653_v50  ;;  %v2684_v48 = vld [vmem:[#allocation7 + $0x30] sm:$0xff]   ;;  %v2686_v50 = vld [vmem:[#allocation8] sm:$0xff]  }
  0xce   :  { %1756 = vmatpush1.bf16.msra.mxu1 %v2654_v51  ;;  %2434 = vmatprep.subr.bf16.mxu0 %v2655_v52  ;;  %v2687_v51 = vld [vmem:[#allocation8 + $0x8] sm:$0xff]   ;;  %v2688_v52 = vld [vmem:[#allocation8 + $0x10] sm:$0xff]  }
  0xcf   :  { %1757 = vmatprep.subr.bf16.mxu1 %v2828_v47  ;;  %1746 = vmatprep.mubr.bf16.mxu0 %v140_v10 }
  0xd0   :  { %2228 = vmatprep.mubr.msk.bf16.mxu1 %vm1378_vm1, %v142_v18 }
  0xd1   :  { %2435 = vmatpush3.bf16.msra.mxu0 %v2656_v53 }
  0xd2   :  { %1758 = vmatpush1.bf16.msra.mxu1 %v2657_v54  ;;  %2436 = vmatprep.subr.bf16.mxu0 %v2658_v55 }
  0xd3   :  { %1759 = vmatprep.subr.bf16.mxu1 %v2828_v47 }
  0xd5   :  { %2437 = vmatpush3.bf16.msra.mxu0 %v2659_v56 }
  0xd6   :  { %1760 = vmatpush1.bf16.msra.mxu1 %v2660_v57  ;;  %2438 = vmatprep.subr.bf16.mxu0 %v2661_v58 }
  0xd7   :  { %1761 = vmatprep.subr.bf16.mxu1 %v2828_v47 }
  0xd9   :  { %2439 = vmatpush3.bf16.msra.mxu0 %v2662_v59  ;;  %v2689_v59 = vld [vmem:[#allocation8 + $0x18] sm:$0xff]  }
  0xda   :  { %1762 = vmatpush1.bf16.msra.mxu1 %v2663_v60  ;;  %2440 = vmatprep.subr.bf16.mxu0 %v2664_v61 }
  0xdb   :  { %1763 = vmatprep.subr.bf16.mxu1 %v2828_v47 }
  0xdd   :  { %2441 = vmatpush3.bf16.msra.mxu0 %v2665_v62 }
  0xde   :  { %1764 = vmatpush1.bf16.msra.mxu1 %v2666_v63  ;;  %2442 = vmatprep.subr.bf16.mxu0 %v2667_v0 }
  0xdf   :  { %1765 = vmatprep.subr.bf16.mxu1 %v2828_v47 }
  0xe1   :  { %2443 = vmatpush3.bf16.msra.mxu0 %v2668_v1 }
  0xe2   :  { %1766 = vmatpush1.bf16.msra.mxu1 %v2669_v2  ;;  %2444 = vmatprep.subr.bf16.mxu0 %v2670_v3 }
  0xe3   :  { %1767 = vmatprep.subr.bf16.mxu1 %v2828_v47 }
  0xe5   :  { %2445 = vmatpush3.bf16.msra.mxu0 %v2671_v4 }
  0xe6   :  { %1768 = vmatpush1.bf16.msra.mxu1 %v2672_v6  ;;  %2446 = vmatprep.subr.bf16.mxu0 %v2673_v7  ;;  %v2691_v7 = vld [vmem:[#allocation8 + $0x28] sm:$0xff]  }
  0xe7   :  { %1769 = vmatprep.subr.bf16.mxu1 %v2828_v47 }
  0xe9   :  { %2447 = vmatpush3.bf16.msra.mxu0 %v2674_v9 }
  0xea   :  { %1770 = vmatpush1.bf16.msra.mxu1 %v2675_v16  ;;  %2472 = vmatprep.subr.bf16.mxu0 %v2829_v25 }
  0xeb   :  { %1771 = vmatprep.subr.bf16.mxu1 %v2828_v47 }
  0xec   :  { %1747 = vmatmul.mubr.bf16.vlgmr.msra.gmra.mrb[16].mxu0 %v139_v19 }
  0xed   :  { %2473 = vmatpush3.bf16.msra.mxu0 %v2678_v24  ;;  %2488 = vmatprep.mubr.msk.bf16.mxu0 %vm2830_vm2, %v2829_v25 }
  0xee   :  { %1772 = vmatpush1.bf16.msra.mxu1 %v2676_v20  ;;  %2474 = vmatprep.subr.bf16.mxu0 %v2829_v25 }
  0xef   :  { %1773 = vmatprep.subr.bf16.mxu1 %v2828_v47  ;;  %v2683_v47 = vld [vmem:[#allocation7 + $0x28] sm:$0xff]  }
  0xf1   :  { %2475 = vmatpush3.bf16.msra.mxu0 %v2679_v26 }
  0xf2   :  { %1774 = vmatpush1.bf16.msra.mxu1 %v1384_v17  ;;  %2476 = vmatprep.subr.bf16.mxu0 %v2829_v25 }
  0xf3   :  { %2492 = vmatprep.subr.bf16.mxu1 %v2829_v25 }
  0xf5   :  { %1788 = vmatmul.mubr.bf16.vlgmr.msra.gmra.mrb[16].mxu1 %v141_v23  ;;  %2477 = vmatpush3.bf16.msra.mxu0 %v2680_v27 }
  0xf6   :  { %2478 = vmatprep.subr.bf16.mxu0 %v2829_v25  ;;  %2508 = vmatprep.mubr.msk.bf16.mxu1 %vm2830_vm2, %v2829_v25 }
  0xf7   :  { %2493 = vmatpush3.bf16.msra.mxu1 %v2686_v50 }
  0xf8   :  { %2494 = vmatprep.subr.bf16.mxu1 %v2829_v25 }
  0xf9   :  { %2479 = vmatpush3.bf16.msra.mxu0 %v2681_v28 }
  0xfa   :  { %2480 = vmatprep.subr.bf16.mxu0 %v2829_v25 }
  0xfb   :  { %2495 = vmatpush3.bf16.msra.mxu1 %v2687_v51 }
  0xfc   :  { %2496 = vmatprep.subr.bf16.mxu1 %v2829_v25 }
  0xfd   :  { %2481 = vmatpush3.bf16.msra.mxu0 %v2682_v46 }
  0xfe   :  { %2482 = vmatprep.subr.bf16.mxu0 %v2829_v25 }
  0xff   :  { %2497 = vmatpush3.bf16.msra.mxu1 %v2688_v52 }
 0x100   :  { %2498 = vmatprep.subr.bf16.mxu1 %v2829_v25 }
 0x101   :  { %2483 = vmatpush3.bf16.msra.mxu0 %v2683_v47 }
 0x102   :  { %2484 = vmatprep.subr.bf16.mxu0 %v2829_v25 }
 0x103   :  { %2499 = vmatpush3.bf16.msra.mxu1 %v2689_v59  ;;  %v2693_v59 = vld [vmem:[#allocation8 + $0x38] sm:$0xff]  }
 0x104   :  { %2500 = vmatprep.subr.bf16.mxu1 %v2829_v25 }
 0x105   :  { %2485 = vmatpush3.bf16.msra.mxu0 %v2684_v48 }
 0x106   :  { %2486 = vmatprep.subr.bf16.mxu0 %v2829_v25 }
 0x107   :  { %2501 = vmatpush3.bf16.msra.mxu1 %v2690_v5 }
 0x108   :  { %2502 = vmatprep.subr.bf16.mxu1 %v2829_v25 }
 0x109   :  { %2487 = vmatpush3.bf16.msra.mxu0 %v2685_v49 }
 0x10b   :  { %2503 = vmatpush3.bf16.msra.mxu1 %v2691_v7 }
 0x10c   :  { %2504 = vmatprep.subr.bf16.mxu1 %v2829_v25 }
 0x13f   :  { %v2272_v29 = vpop.f32.mrb[0].mxu0 }
 0x140   :  { %v2294_v30 = vpop.f32.mrb[0].mxu1  ;;  %v2273_v32 = vpop.f32.mrb[1].mxu0 }
 0x141   :  { %v2274_v33 = vadd.f32 %v2273_v32, %v2272_v29  ;;  %v2295_v34 = vpop.f32.mrb[1].mxu1  ;;  %v2275_v35 = vpop.f32.mrb[2].mxu0 }
 0x142   :  { %v2296_v36 = vadd.f32 %v2295_v34, %v2294_v30  ;;  %v2297_v37 = vpop.f32.mrb[2].mxu1  ;;  %v2276_v38 = vpop.f32.mrb[3].mxu0 }
 0x143   :  { %v1421_v39 = vadd.f32 %v2274_v33, %v2073_v31  ;;  %v2277_v40 = vadd.f32 %v2276_v38, %v2275_v35  ;;  %v2298_v41 = vpop.f32.mrb[3].mxu1 }
 0x144   :  { %v2299_v42 = vadd.f32 %v2298_v41, %v2297_v37 }
 0x145   :  { %v1462_v43 = vadd.f32 %v2296_v36, %v1421_v39  ;;  %v1424_v44 = vadd.f32 %v2277_v40, %v2073_v31 }
 0x147   :  { %v1465_v45 = vadd.f32 %v2299_v42, %v1424_v44 }
 0x15f   :  { %v2316_v53 = vpop.f32.mrb[4].mxu0 }
 0x160   :  { %v2338_v54 = vpop.f32.mrb[4].mxu1  ;;  %v2317_v55 = vpop.f32.mrb[5].mxu0 }
 0x161   :  { %v2318_v56 = vadd.f32 %v2317_v55, %v2316_v53  ;;  %v2339_v57 = vpop.f32.mrb[5].mxu1  ;;  %v2319_v58 = vpop.f32.mrb[6].mxu0 }
 0x162   :  { %v2340_v60 = vadd.f32 %v2339_v57, %v2338_v54  ;;  %v2341_v61 = vpop.f32.mrb[6].mxu1  ;;  %v2320_v62 = vpop.f32.mrb[7].mxu0 }
 0x163   :  { %v1503_v63 = vadd.f32 %v2318_v56, %v1462_v43  ;;  %v2321_v0 = vadd.f32 %v2320_v62, %v2319_v58  ;;  %v2342_v1 = vpop.f32.mrb[7].mxu1  ;;  %v2692_v58 = vld [vmem:[#allocation8 + $0x30] sm:$0xff]  }
 0x164   :  { %v2343_v2 = vadd.f32 %v2342_v1, %v2341_v61  ;;  %2505 = vmatpush3.bf16.msra.mxu1 %v2692_v58 }
 0x165   :  { %v1544_v3 = vadd.f32 %v2340_v60, %v1503_v63  ;;  %v1506_v4 = vadd.f32 %v2321_v0, %v1465_v45  ;;  %2506 = vmatprep.subr.bf16.mxu1 %v2829_v25  ;;  %v2229_v60 = vld [vmem:[%s2992_s4] ss:$0 sm:$0xff]  ;;  %s2831_s4 = smov [#allocation10]  }
 0x166   :  { %v2238_v25 = vld [vmem:[%s2994_s6] ss:$0 sm:$0xff]  ;;  %s2059_s6 = sshll.u32 %s2831_s4, 4  ;;  %s2060_s6 = int_to_ptr.vmem [resolvable:$true] %s2059_s6 }
 0x167   :  { %v1547_v6 = vadd.f32 %v2343_v2, %v1506_v4  ;;  %s2790_s9 = scalar_lea.vmem %s2060_s6, 128  ;;  %p2795_p5 = scmp.lt.s32.totalorder %s2060_s6, %s2060_s6 }
 0x168   :  { %2507 = vmatpush3.bf16.msra.mxu1 %v2693_v59  ;;  %p2791_p4 = scmp.ne.s32.totalorder %s2060_s6, %s2790_s9  ;;  %p2796_p6 = scmp.lt.s32.totalorder %s2790_s9, %s2790_s9 }
 0x16a   :  { %p2797_p7 = por %p2796_p6, %p2795_p5 }
 0x16c   :  { %p2798_p8 = pnand %p2797_p7, %p2791_p4 }
 0x17f   :  { %v2360_v8 = vpop.f32.mrb[8].mxu0 }
 0x180   :  { %v2382_v9 = vpop.f32.mrb[8].mxu1  ;;  %v2361_v10 = vpop.f32.mrb[9].mxu0 }
 0x181   :  { %v2383_v11 = vpop.f32.mrb[9].mxu1  ;;  %v2362_v12 = vadd.f32 %v2361_v10, %v2360_v8  ;;  %v2363_v14 = vpop.f32.mrb[10].mxu0 }
 0x182   :  { %v2384_v13 = vadd.f32 %v2383_v11, %v2382_v9  ;;  %v2385_v15 = vpop.f32.mrb[10].mxu1  ;;  %v2364_v16 = vpop.f32.mrb[11].mxu0 }
 0x183   :  { %v2386_v17 = vpop.f32.mrb[11].mxu1  ;;  %v1585_v18 = vadd.f32 %v2362_v12, %v1544_v3  ;;  %v2365_v19 = vadd.f32 %v2364_v16, %v2363_v14 }
 0x184   :  { %v2387_v20 = vadd.f32 %v2386_v17, %v2385_v15 }
 0x185   :  { %v1626_v21 = vadd.f32 %v2384_v13, %v1585_v18  ;;  %v1588_v22 = vadd.f32 %v2365_v19, %v1547_v6 }
 0x187   :  { %v1629_v23 = vadd.f32 %v2387_v20, %v1588_v22 }
 0x19f   :  { %v2404_v24 = vpop.f32.mrb[12].mxu0 }
 0x1a0   :  { %v2426_v26 = vpop.f32.mrb[12].mxu1  ;;  %v2405_v27 = vpop.f32.mrb[13].mxu0 }
 0x1a1   :  { %v2406_v28 = vadd.f32 %v2405_v27, %v2404_v24  ;;  %v2427_v29 = vpop.f32.mrb[13].mxu1  ;;  %v2407_v30 = vpop.f32.mrb[14].mxu0 }
 0x1a2   :  { %v2428_v31 = vadd.f32 %v2427_v29, %v2426_v26  ;;  %v2429_v32 = vpop.f32.mrb[14].mxu1  ;;  %v2408_v33 = vpop.f32.mrb[15].mxu0 }
 0x1a3   :  { %v1667_v34 = vadd.f32 %v2406_v28, %v1626_v21  ;;  %v2409_v35 = vadd.f32 %v2408_v33, %v2407_v30  ;;  %v2430_v36 = vpop.f32.mrb[15].mxu1 }
 0x1a4   :  { %v2431_v37 = vadd.f32 %v2430_v36, %v2429_v32 }
 0x1a5   :  { %v1708_v38 = vadd.f32 %v2428_v31, %v1667_v34  ;;  %v1670_v39 = vadd.f32 %v2409_v35, %v1629_v23 }
 0x1a7   :  { %v1711_v40 = vadd.f32 %v2431_v37, %v1670_v39 }
 0x1bf   :  { %v2448_v41 = vpop.f32.mrb[16].mxu0 }
 0x1c0   :  { %v2449_v42 = vpop.f32.mrb[17].mxu0 }
 0x1c1   :  { %v2450_v43 = vadd.f32 %v2449_v42, %v2448_v41  ;;  %v2451_v44 = vpop.f32.mrb[18].mxu0 }
 0x1c2   :  { %v2452_v45 = vpop.f32.mrb[19].mxu0 }
 0x1c3   :  { %v2453_v46 = vadd.f32 %v2452_v45, %v2451_v44  ;;  %v1749_v47 = vadd.f32 %v2450_v43, %v1708_v38 }
 0x1c5   :  { %v1752_v48 = vadd.f32 %v2453_v46, %v1711_v40 }
 0x1c8   :  { %v1789_v49 = vpop.f32.mrb[16].mxu1 }
 0x1c9   :  { %v1790_v50 = vadd.f32 %v1789_v49, %v1749_v47  ;;  %v1791_v51 = vpop.f32.mrb[17].mxu1 }
 0x1ca   :  { %v1792_v52 = vpop.f32.mrb[18].mxu1 }
 0x1cb   :  { %v1793_v53 = vadd.f32 %v1792_v52, %v1752_v48  ;;  %v1794_v54 = vpop.f32.mrb[19].mxu1  ;;  %v1796_v55 = vmax.f32 %v1790_v50, 0.0 }
 0x1cd   :  { %v1797_v56 = vmax.f32 %v1793_v53, 0.0 }
 0x1cf   :  { %v1798_v57 = vpack.c.bf16 %v1797_v56, %v1796_v55 }
 0x1d1   :  { %2489 = vmatmul.mubr.bf16.vlgmr.msra.gmra.mrb[20].mxu0 %v1798_v57 }
 0x2a4   :  { %v1904_v61 = vpop.f32.mrb[20].mxu0 }
 0x2a5   :  { %v1905_v62 = vadd.f32 %v2229_v60, %v1904_v61  ;;  %v2490_v63 = vpop.f32.mrb[21].mxu0 }
 0x2a6   :  { %v1907_v0 = vpop.f32.mrb[22].mxu0 }
 0x2a7   :  { %v1908_v1 = vadd.f32 %v2229_v60, %v1907_v0  ;;  %v2491_v2 = vpop.f32.mrb[23].mxu0  ;;  %v1911_v3 = vmax.f32 %v1905_v62, 0.0 }
 0x2a9   :  { %v1912_v4 = vmax.f32 %v1908_v1, 0.0 }
 0x2ab   :  { %v1913_v5 = vpack.c.bf16 %v1912_v4, %v1911_v3 }
 0x2ad   :  { %2509 = vmatmul.mubr.bf16.vlgmr.msra.gmra.mrb[20].mxu1 %v1913_v5 }
 0x380   :  { %v2019_v6 = vpop.f32.mrb[20].mxu1 }
 0x381   :  { %v2020_v7 = vadd.f32 %v2238_v25, %v2019_v6  ;;  %v2510_v8 = vpop.f32.mrb[21].mxu1 }
 0x382   :  { %v2022_v9 = vpop.f32.mrb[22].mxu1 }
 0x383   :  { %2026 = vmax.xlane.f32.xlu0 %v2020_v7  ;;  %v2511_v10 = vpop.f32.mrb[23].mxu1  ;;  %v2023_v11 = vadd.f32 %v2238_v25, %v2022_v9 }
 0x387   :  { %2028 = vmax.xlane.f32.xlu0 %v2023_v11 }
 0x410   :  { %v2027_v12 = vpop.xlane.xlu0 %2026 }
 0x411   :  { %v2030_v13 = vsub.f32 %v2020_v7, %v2027_v12 }
 0x413   :  { %v2032_v14 = vmul.f32 1.442695, %v2030_v13 }
 0x414   :  { %v2029_v15 = vpop.xlane.xlu0 %2028 }
 0x415   :  { %2694 = vpow2.f32 %v2032_v14  ;;  %v2031_v16 = vsub.f32 %v2023_v11, %v2029_v15 }
 0x417   :  { %v2034_v17 = vmul.f32 1.442695, %v2031_v16 }
 0x419   :  { %2696 = vpow2.f32 %v2034_v17 }
 0x41f   :  { %v2695_v18 = vpop.eup %2694 }
 0x420   :  { %2036 = vadd.xlane.f32.xlu1 %v2695_v18 }
 0x423   :  { %v2697_v19 = vpop.eup %2696 }
 0x424   :  { %2038 = vadd.xlane.f32.xlu1 %v2697_v19 }
 0x4ad   :  { %v2037_v20 = vpop.xlane.xlu1 %2036 }
 0x4ae   :  { %2698 = vrcp.f32 %v2037_v20 }
 0x4b1   :  { %v2039_v21 = vpop.xlane.xlu1 %2038 }
 0x4b2   :  { %2700 = vrcp.f32 %v2039_v21 }
 0x4b8   :  { %v2699_v22 = vpop.eup %2698 }
 0x4b9   :  { %v2041_v24 = vmul.f32 %v2699_v22, %v2695_v18 }
 0x4bc   :  { %v2701_v23 = vpop.eup %2700 }
 0x4bd   :  { %v2043_v26 = vmul.f32 %v2701_v23, %v2697_v19 }
 0x4bf   :  { %v2254_v27 = vpack.c.bf16 %v2043_v26, %v2041_v24 }
 0x4c1   :  { %2255 = vst [vmem:[#allocation10] sm:$0xff] %v2254_v27  }
 0x4c2   :  { %2801 = shalt.err (!%p2798_p8)
}
 0x4c3   :  { %s2802_s14 = scalar_lea.hbm %s2995_s7, 128 }
 0x4c4   :  { %p2803_p9 = scmp.ne.s32.totalorder %s2995_s7, %s2802_s14  ;;  %p2806_p10 = scmp.lt.u32.totalorder %s2802_s14, %s2995_s7 }
 0x4c6   :  { %p2808_p11 = pnand %p2806_p10, %p2803_p9 }
 0x4c8   :  { %2811 = shalt.err (!%p2808_p11)
}
 0x4c9   :  { %2065 = dma.vmem_to_hbm [thread:$0]  %s2060_s6, 128, %s2995_s7, [#allocation4], %s2821_s11, %s2821_s11, %s2822_s12  }
 0x4ca   :  { %2818 = dma.done.wait [#allocation4], 128  }
 0x4cb   :  { %2819 = vsyncadd [#allocation4], 4294967168 }
 0x4cc   :  { %2069 = vsyncpa [#allocation3], 1 }
 0x4cd   :  { %2070 = vsyncpa [#allocation6], 1 }
 0x4ce   :  { %2071 = vsyncpa [#allocation9], 1 }
 0x4cf   :  { %2072 = vsyncpa [#allocation4], 1 }

</bundles_post_ra>
